<compile_context>
chip_gen: v6e
topology: v6e:2x2x1
jax: 0.10.0
libtpu: 0.0.40
codegen_flags: <defaults>
</compile_context>

<pallas_src>
import functools

import numpy as np
import jax
import jax.numpy as jnp
from jax.experimental import pallas as pl
from jax.experimental.pallas import tpu as pltpu


def _round_up(x, m):
    return ((x + m - 1) // m) * m


# ----------------------------------------------------------------------------
# Pallas kernel: fused STFT round-trip for a tile of frames (single MXU matmul).
# ----------------------------------------------------------------------------
def _stft_roundtrip_kernel(frames_ref, k_ref, o_ref):
    # frames: (TM, L) bf16,  K: (L, L) bf16 (VMEM-resident across the grid),
    # output: (TM, L) f32 (MXU accumulates in f32).
    o_ref[...] = jnp.dot(frames_ref[...], k_ref[...],
                         preferred_element_type=jnp.float32)


def stft_roundtrip(frames, roundtrip, tm=512):
    """frames: (M, L) float32 -> per-frame inverse_basis @ [mag*cos ; mag*sin], shape (M, L)."""
    M, L = frames.shape
    assert roundtrip.shape == (L, L)

    # Cap TM so the grid has >= 2 parallel steps when possible (v7x has 2 TCs),
    # while staying a multiple of 8 (sublane alignment of the (TM, L) blocks).
    TM = max(8, min(tm, _round_up(-(-M // 2), 8)))
    Mp = _round_up(M, TM)

    frames = frames.astype(jnp.bfloat16)
    if Mp != M:
        frames = jnp.pad(frames, ((0, Mp - M), (0, 0)))

    # VMEM footprint: double-buffered bf16 frame tile + double-buffered f32 output
    # tile + double-buffered bf16 basis + headroom. Clamp to [32 MiB, 64 MiB] so the
    # limit is raised above v5e's 16 MiB scoped default but stays within v7x's
    # 64 MiB physical VMEM per TensorCore.
    vmem_bytes = (2 * TM * L * 2 + 2 * TM * L * 4 + 2 * L * L * 2 + (2 << 20))
    vmem_limit = int(min(max(vmem_bytes, 32 << 20), 64 << 20))

    cost = pl.CostEstimate(
        flops=2 * Mp * L * L,
        transcendentals=0,
        bytes_accessed=Mp * L * 2 + L * L * 2 + Mp * L * 4,
    )

    out = pl.pallas_call(
        _stft_roundtrip_kernel,
        out_shape=jax.ShapeDtypeStruct((Mp, L), jnp.float32),
        grid=(Mp // TM,),
        in_specs=[
            pl.BlockSpec((TM, L), lambda i: (i, 0)),   # frame tile (bf16)
            pl.BlockSpec((L, L), lambda i: (0, 0)),    # combined basis, VMEM-resident
        ],
        out_specs=pl.BlockSpec((TM, L), lambda i: (i, 0)),
        compiler_params=pltpu.CompilerParams(
            dimension_semantics=("parallel",),
            vmem_limit_bytes=vmem_limit,
        ),
        cost_estimate=cost,
    )(frames, roundtrip)
    return out[:M] if Mp != M else out


# ----------------------------------------------------------------------------
# Buffer construction (mirrors STFT.__init__, host-side numpy)
# ----------------------------------------------------------------------------
def make_stft_basis(filter_length=1024, win_length=None, window="hann"):
    win_length = win_length if win_length else filter_length
    assert filter_length >= win_length
    if window != "hann":
        # TODO(synk): other window types (bartlett/hamming/blackman/...) not implemented.
        raise NotImplementedError(window)

    cutoff = filter_length // 2 + 1
    fourier_basis = np.fft.fft(np.eye(filter_length))
    fourier_basis = np.vstack(
        [np.real(fourier_basis[:cutoff, :]), np.imag(fourier_basis[:cutoff, :])]
    )                                                   # (2*cutoff, L)
    inverse_basis = np.linalg.pinv(fourier_basis)       # (L, 2*cutoff)

    # scipy.signal.get_window('hann', win_length, fftbins=True) == periodic Hann
    n = np.arange(win_length)
    fft_window = 0.5 - 0.5 * np.cos(2.0 * np.pi * n / win_length)
    lpad = (filter_length - win_length) // 2            # pad_center (no-op when equal)
    fft_window = np.pad(fft_window, (lpad, filter_length - win_length - lpad))

    forward_basis = fourier_basis * fft_window[None, :]     # forward_basis *= fft_window
    inverse_basis = inverse_basis * fft_window[:, None]     # (inv.T * fft_window).T

    # mag*cos(phase) = re, mag*sin(phase) = im  =>  the transform->inverse round trip
    # is a single linear map  y_frame = K @ frame,  K = inverse_basis @ forward_basis.
    # Precompute its transpose (row-frame layout) in float64, store as bf16 for the MXU.
    roundtrip = (inverse_basis @ forward_basis).T            # (L, L)

    return dict(
        roundtrip=jnp.asarray(roundtrip.astype(np.float32)).astype(jnp.bfloat16),
        fft_window=jnp.asarray(fft_window.astype(np.float32)),
    )


# ----------------------------------------------------------------------------
# STFT.forward
# ----------------------------------------------------------------------------
def stft_forward(input_data, basis, *, filter_length, hop_length):
    """audio (B, num_samples) -> STFT magnitude/phase -> iSTFT reconstruction (B, num_samples')."""
    assert hop_length * 2 == filter_length, "module supports 50% overlap only"
    pad = filter_length // 2
    B, ns = input_data.shape

    x = jnp.pad(input_data.astype(jnp.float32), ((0, 0), (pad, pad)), mode="reflect")
    padded = ns + 2 * pad
    n_frames = (padded - filter_length) // hop_length + 1

    # 50%-overlap framing: frame t = [segment t | segment t+1] (hop-length segments).
    # Uses exactly the same samples as torch's unfold(filter_length, hop_length).
    x = x[:, : (n_frames + 1) * hop_length]
    segs = x.reshape(B, n_frames + 1, hop_length)
    frames = jnp.concatenate([segs[:, :-1, :], segs[:, 1:, :]], axis=-1)   # (B, nf, L)

    # Fused Pallas kernel: forward DFT -> mag/phase -> recombine -> inverse basis,
    # collapsed to one matmul against the precomputed round-trip matrix.
    y = stft_roundtrip(frames.reshape(B * n_frames, filter_length), basis["roundtrip"])
    y = y.reshape(B, n_frames, 2, hop_length)

    # torch.nn.Fold overlap-add (kernel = L = 2*hop, stride = hop), expressed as two
    # shifted padded adds (no scatter-add lowering).
    lo = y[:, :, 0, :].reshape(B, n_frames * hop_length)
    hi = y[:, :, 1, :].reshape(B, n_frames * hop_length)
    ola = (jnp.pad(lo, ((0, 0), (0, hop_length)))
           + jnp.pad(hi, ((0, 0), (hop_length, 0))))        # (B, (nf+1)*hop)

    # Overlap-added window^2 normalization (same Fold applied to fft_window**2),
    # applied as a precomputed reciprocal multiply.
    w2 = basis["fft_window"] ** 2
    wss = (jnp.pad(jnp.tile(w2[:hop_length], n_frames), (0, hop_length))
           + jnp.pad(jnp.tile(w2[hop_length:], n_frames), (hop_length, 0)))

    end = (n_frames + 1) * hop_length - pad
    inv_wss = 1.0 / wss[pad:end]
    return ola[:, pad:end] * inv_wss[None, :]


# ----------------------------------------------------------------------------
if __name__ == "__main__":
    key = jax.random.PRNGKey(0)

    B, NS = 2, 2048
    FILTER_LENGTH, HOP_LENGTH = 512, 256          # 50%-overlap config (hop = filter/2)

    basis = make_stft_basis(filter_length=FILTER_LENGTH, window="hann")
    audio = jax.random.normal(key, (B, NS), jnp.float32)

    stft_fn = jax.jit(functools.partial(
        stft_forward, filter_length=FILTER_LENGTH, hop_length=HOP_LENGTH))
    out = jax.block_until_ready(stft_fn(audio, basis))

    assert out.shape == (B, NS), out.shape
    assert bool(jnp.all(jnp.isfinite(out)))
    # Hann @ 50% overlap with window^2 normalization is a perfect-reconstruction pair:
    # the round-trip reproduces the input audio (up to bf16-operand matmul rounding).
    err_max = float(jnp.max(jnp.abs(out - audio)))
    err_mean = float(jnp.mean(jnp.abs(out - audio)))
    assert err_max < 1.5e-1 and err_mean < 1e-2, (err_max, err_mean)
    print("KERNEL_OK")
</pallas_src>

<mosaic_0001>
module attributes {stable_mosaic.version = 11 : i64} {
  func.func @_stft_roundtrip_kernel(%arg0: i32, %arg1: memref<16x512xbf16, #tpu.memory_space<vmem>>, %arg2: memref<512x512xbf16, #tpu.memory_space<vmem>>, %arg3: memref<16x512xf32, #tpu.memory_space<vmem>>) attributes {dimension_semantics = [#tpu.dimension_semantics<parallel>], iteration_bounds = array<i64: 2>, scalar_prefetch = 0 : i64, scratch_operands = 0 : i64, tpu.core_type = #tpu.core_type<tc>, window_params = [{transform_indices = @transform_0, window_bounds = array<i64: 16, 512>}, {pipeline_mode = #tpu.pipeline_mode<synchronous>, transform_indices = @transform_1, window_bounds = array<i64: 512, 512>}, {transform_indices = @transform_2, window_bounds = array<i64: 16, 512>}]} {
    %c0 = arith.constant 0 : index
    %c0_0 = arith.constant 0 : index
    %0 = vector.load %arg1[%c0, %c0_0] : memref<16x512xbf16, #tpu.memory_space<vmem>>, vector<16x512xbf16>
    %c0_1 = arith.constant 0 : index
    %c0_2 = arith.constant 0 : index
    %1 = vector.load %arg2[%c0_1, %c0_2] : memref<512x512xbf16, #tpu.memory_space<vmem>>, vector<512x512xbf16>
    %cst = arith.constant dense<0.000000e+00> : vector<16x512xf32>
    %2 = tpu.matmul %0, %1, %cst {dimension_numbers = #tpu.dot_dimension_numbers<[1], [0], [0], [1], [0, 0, 1, 1], [], []>} : vector<16x512xbf16>, vector<512x512xbf16>, vector<16x512xf32> -> vector<16x512xf32>
    %c0_3 = arith.constant 0 : index
    %c0_4 = arith.constant 0 : index
    %3 = vector.load %arg3[%c0_3, %c0_4] : memref<16x512xf32, #tpu.memory_space<vmem>>, vector<16x512xf32>
    tpu.vector_store %arg3[%c0_3, %c0_4], %2 {strides = array<i32>} : memref<16x512xf32, #tpu.memory_space<vmem>>, vector<16x512xf32>,
    return
  }
  func.func @transform_0(%arg0: i32) -> (i32, i32) {
    %c0_i32 = arith.constant 0 : i32
    %c0_i32_0 = arith.constant 0 : i32
    return %arg0, %c0_i32 : i32, i32
  }
  func.func @transform_1(%arg0: i32) -> (i32, i32) {
    %c0_i32 = arith.constant 0 : i32
    %c0_i32_0 = arith.constant 0 : i32
    %c0_i32_1 = arith.constant 0 : i32
    return %c0_i32, %c0_i32_0 : i32, i32
  }
  func.func @transform_2(%arg0: i32) -> (i32, i32) {
    %c0_i32 = arith.constant 0 : i32
    %c0_i32_0 = arith.constant 0 : i32
    return %arg0, %c0_i32 : i32, i32
  }
}

</mosaic_0001>

<bundles_post_ra>
// kernel: integer_pow.1
= control target key start
LH: loop header
LB: loop body
LE: loop exit
PB: predicated region body
PF: predicated region fallthrough
CT: control target
= control target key end

     0   :  { %s34_s0 = inlined_call_operand.vmem [shape: f32[512], index: 0, kind: input, shape index: {}, may-alias: {0,1}]   ;;  %s35_s1 = inlined_call_operand.vmem [shape: f32[512], index: 1, kind: input, shape index: {}, may-alias: {0,1}]   ;;  %s36_s2 = inlined_call_operand.vmem [shape: f32[512], index: 2, kind: output, shape index: {}]  }
   0x1   :  { %v3_v0 = vld [vmem:[%s34_s0] sm:$0xf] }
   0x2   :  { %v4_v1 = vld [vmem:[%s35_s1] sm:$0xf] }
   0x3   :  { %v7_v2 = vmul.f32 %v4_v1, %v3_v0 }
   0x5   :  { %9 = vst [vmem:[%s36_s2] sm:$0xf] %v7_v2 }

// kernel: tile.13
= control target key start
LH: loop header
LB: loop body
LE: loop exit
PB: predicated region body
PF: predicated region fallthrough
CT: control target
= control target key end

     0   :  { %s46_s0 = inlined_call_operand.vmem [shape: f32[256], index: 0, kind: input, shape index: {}]   ;;  %s47_s1 = inlined_call_operand.vmem [shape: f32[9,256], index: 1, kind: output, shape index: {}]  }
   0x1   :  { %v4_v0 = vld [vmem:[%s46_s0] ss:$0 sm:$0xff]  ;;  %v15_v1 = vld [vmem:[%s46_s0 + $0x1] ss:$0 sm:$0xff] }
   0x2   :  { %5 = vst [vmem:[%s47_s1] sm:$0xff] %v4_v0  ;;  %14 = vst [vmem:[%s47_s1 + $0x10] sm:$0xff] %v4_v0 }
   0x3   :  { %16 = vst [vmem:[%s47_s1 + $0x8] sm:$0xff] %v15_v1  ;;  %17 = vst [vmem:[%s47_s1 + $0x18] sm:$0xff] %v15_v1 }

// kernel: tile.14
= control target key start
LH: loop header
LB: loop body
LE: loop exit
PB: predicated region body
PF: predicated region fallthrough
CT: control target
= control target key end

     0   :  { %s9_s6 = smov 3  ;;  %s45_s0 = inlined_call_operand.vmem [shape: f32[9,256], index: 0, kind: input, shape index: {}]   ;;  %s46_s1 = inlined_call_operand.vmem [shape: f32[2304], index: 1, kind: output, shape index: {}]  }
   0x1   :  { %v2_v0 = vld [vmem:[%s45_s0] sm:$0xff]   ;;  %v13_v1 = vld [vmem:[%s45_s0 + $0x8] sm:$0xff]  }
   0x2   :  { %v15_v2 = vld [vmem:[%s45_s0 + $0x10] ss:$8 sm:%s9_s6]   ;;  %3 = vst [vmem:[%s46_s1] ss:$2 sm:$0xff] %v2_v0   ;;  %14 = vst [vmem:[%s46_s1 + $0x1] ss:$2 sm:$0xff] %v13_v1  }
   0x3   :  { %16 = vst [vmem:[%s46_s1 + $0x10] sm:$0x3] %v15_v2  }

// kernel: stft_forward.1
= control target key start
LH: loop header
LB: loop body
LE: loop exit
PB: predicated region body
PF: predicated region fallthrough
CT: control target
= control target key end

     0   :  { %7 = vsyncpa [#allocation3], 0  ;;  %s1633_s9 = smov 0   ;;  %s1703_s0 = inlined_call_operand.vmem [shape: bf16[32,512], index: 0, kind: input, shape index: {}]   ;;  %s1704_s1 = inlined_call_operand.hbm [shape: bf16[512,512], index: 1, kind: input, shape index: {}]   ;;  %s1705_s2 = inlined_call_operand.vmem [shape: f32[32,512], index: 2, kind: output, shape index: {}]  }
   0x1 LB: > { %s1209_s10 = sadd.s32 4294967295, %s1613_s9   ;;  %p1211_p0 = scmp.ge.s32.totalorder %s1613_s9, 1  ;;  %s1613_s9 = sphi %s1633_s9, %s13_s9  }
   0x2   : > { %p91_p1 = scmp.lt.s32.totalorder %s1613_s9, 3  ;;  %s1615_s11 = smov [#allocation2]  }
   0x3   : > { %s103_s12 = sshll.u32 %s1615_s11, 4  ;;  %p1647_p3 = scmp.eq.s32.totalorder %s1209_s10, 0  ;;  %s104_s12 = int_to_ptr.vmem [resolvable:$true] %s103_s12 }
   0x4   : > { %p1641_p2 = pnand %p1211_p0, %p91_p1  ;;  %s1588_s15 = scalar_lea.vmem %s104_s12, 16384 }
   0x5   : > { %p1589_p7 = scmp.ne.s32.totalorder %s104_s12, %s1588_s15  ;;  %p1596_p10 = scmp.lt.s32.totalorder %s104_s12, %s104_s12 }
   0x6   : > { %p1362_p4 = pneg %p1641_p2  ;;  %p1597_p11 = scmp.lt.s32.totalorder %s1588_s15, %s1588_s15 }
   0x8   : > { %p1363_p5 = pnand %p1647_p3, %p1362_p4  ;;  %p1598_p12 = por %p1597_p11, %p1596_p10 }
   0xa   : > { %p1579_p6 = pneg %p1363_p5 }
   0xc   : > { %p1591_p8 = pnand %p1589_p7, %p1579_p6 }
   0xe   : > { %p1592_p9 = pneg %p1591_p8 }
  0x10   : > { %p1599_p13 = pnand %p1598_p12, %p1592_p9 }
  0x12   : > { %1602 = shalt.err (!%p1599_p13)
}
  0x13   : > { %s1616_s16 = smov 256   ;;  %s1617_s17 = smov 16  }
  0x14   : > { %1365 = dma.hbm_to_vmem [thread:$0]  (!%p1363_p5), %s1704_s1, 16384, %s104_s12, [#allocation3], %s1616_s16, %s1616_s16, %s1617_s17  }
  0x15   : > { %129 = sbr.rel (%p1641_p2) target bundleno = 359 (0x167), region = 28 }
  0x1a   : > { %1608 = dma.done.wait (%p1647_p3), [#allocation3], 16384  }
  0x1b   : > { %1610 = vsyncadd (%p1647_p3), [#allocation3], 4294950912  ;;  %v1379_v0 = vld [vmem:[#allocation2 + $0xe4] ss:$16 sps:$4 sm:$0xff]   ;;  %v1383_v2 = vld [vmem:[#allocation2 + $0xe0] ss:$16 sps:$4 sm:$0xff]  }
  0x1c   : > { %v1381_v1 = vld [vmem:[#allocation2 + $0x2e4] ss:$16 sps:$4 sm:$0xff]   ;;  %959 = vmatprep.subr.bf16.mxu0 %v1379_v0  ;;  %v1384_v3 = vld [vmem:[#allocation2 + $0x2e0] ss:$16 sps:$4 sm:$0xff]   ;;  %s1216_s20 = sshll.u32 %s1209_s10, 1 }
  0x1d   : > { %1002 = vmatprep.subr.bf16.mxu1 %v1381_v1  ;;  %v1385_v4 = vld [vmem:[#allocation2 + $0xc4] ss:$16 sps:$4 sm:$0xff]   ;;  %960 = vmatpush1.bf16.msra.mxu0 %v1383_v2  ;;  %v1389_v6 = vld [vmem:[#allocation2 + $0xc0] ss:$16 sps:$4 sm:$0xff]   ;;  %p154_p0 = scmp.lt.s32.totalorder %s1216_s20, 3 }
  0x1e   : > { %1003 = vmatpush1.bf16.msra.mxu1 %v1384_v3  ;;  %v1387_v5 = vld [vmem:[#allocation2 + $0x2c4] ss:$16 sps:$4 sm:$0xff]   ;;  %961 = vmatprep.subr.bf16.mxu0 %v1385_v4  ;;  %v1390_v7 = vld [vmem:[#allocation2 + $0x2c0] ss:$16 sps:$4 sm:$0xff]   ;;  %v1483_v2 = vld [vmem:[#allocation2 + $0xec] ss:$16 sps:$4 sm:$0xff]  }
  0x1f   : > { %1004 = vmatprep.subr.bf16.mxu1 %v1387_v5  ;;  %v1391_v8 = vld [vmem:[#allocation2 + $0xa4] ss:$16 sps:$4 sm:$0xff]   ;;  %v1395_v10 = vld [vmem:[#allocation2 + $0xa0] ss:$16 sps:$4 sm:$0xff]   ;;  %s1709_s20 = smov (!%p154_p0, %s1216_s20), 3 }
  0x20   : > { %v1393_v9 = vld [vmem:[#allocation2 + $0x2a4] ss:$16 sps:$4 sm:$0xff]   ;;  %v1396_v11 = vld [vmem:[#allocation2 + $0x2a0] ss:$16 sps:$4 sm:$0xff]   ;;  %s1356_s21 = sshll.u32 %s1709_s20, 4  ;;  %s1357_s25 = sshll.u32 %s1709_s20, 5 }
  0x21   : > { %962 = vmatpush1.bf16.msra.mxu0 %v1389_v6  ;;  %v1397_v12 = vld [vmem:[#allocation2 + $0x84] ss:$16 sps:$4 sm:$0xff]   ;;  %v1401_v14 = vld [vmem:[#allocation2 + $0x80] ss:$16 sps:$4 sm:$0xff]   ;;  %s1672_s24 = scalar_lea.vmem %s1703_s0, %s1356_s21  ;;  %v1486_v3 = vld [vmem:[#allocation2 + $0x2ec] ss:$16 sps:$4 sm:$0xff]   ;;  %s1690_s28 = scalar_lea.vmem %s1705_s2, %s1357_s25 }
  0x22   : > { %1005 = vmatpush1.bf16.msra.mxu1 %v1390_v7  ;;  %963 = vmatprep.subr.bf16.mxu0 %v1391_v8  ;;  %v1399_v13 = vld [vmem:[#allocation2 + $0x284] ss:$16 sps:$4 sm:$0xff]   ;;  %v1402_v15 = vld [vmem:[#allocation2 + $0x280] ss:$16 sps:$4 sm:$0xff]   ;;  %v1480_v51 = vld [vmem:[%s1672_s24 + $0xc] ss:$16 sps:$4 sm:$0xff]  }
  0x23   : > { %1006 = vmatprep.subr.bf16.mxu1 %v1393_v9  ;;  %v1403_v16 = vld [vmem:[#allocation2 + $0x64] ss:$16 sps:$4 sm:$0xff]   ;;  %v1407_v18 = vld [vmem:[#allocation2 + $0x60] ss:$16 sps:$4 sm:$0xff]   ;;  %1034 = vmatprep.mubr.bf16.mxu1 %v1480_v51  ;;  %v1680_v5 = vld [vmem:[%s1672_s24 + $0x8] ss:$16 sps:$4 sm:$0xff]  }
  0x24   : > { %v1405_v17 = vld [vmem:[#allocation2 + $0x264] ss:$16 sps:$4 sm:$0xff]   ;;  %v1408_v19 = vld [vmem:[#allocation2 + $0x260] ss:$16 sps:$4 sm:$0xff]   ;;  %v1481_v6 = vld [vmem:[#allocation2 + $0xe8] ss:$16 sps:$4 sm:$0xff]  }
  0x25   : > { %964 = vmatpush1.bf16.msra.mxu0 %v1395_v10  ;;  %v1409_v20 = vld [vmem:[#allocation2 + $0x44] ss:$16 sps:$4 sm:$0xff]   ;;  %v1413_v22 = vld [vmem:[#allocation2 + $0x40] ss:$16 sps:$4 sm:$0xff]   ;;  %v1484_v7 = vld [vmem:[#allocation2 + $0x2e8] ss:$16 sps:$4 sm:$0xff]  }
  0x26   : > { %1007 = vmatpush1.bf16.msra.mxu1 %v1396_v11  ;;  %965 = vmatprep.subr.bf16.mxu0 %v1397_v12  ;;  %v1411_v21 = vld [vmem:[#allocation2 + $0x244] ss:$16 sps:$4 sm:$0xff]   ;;  %v1414_v23 = vld [vmem:[#allocation2 + $0x240] ss:$16 sps:$4 sm:$0xff]   ;;  %v1489_v8 = vld [vmem:[#allocation2 + $0xcc] ss:$16 sps:$4 sm:$0xff]  }
  0x27   : > { %1008 = vmatprep.subr.bf16.mxu1 %v1399_v13  ;;  %v1415_v24 = vld [vmem:[#allocation2 + $0x24] ss:$16 sps:$4 sm:$0xff]   ;;  %v1419_v26 = vld [vmem:[#allocation2 + $0x20] ss:$16 sps:$4 sm:$0xff]   ;;  %v1492_v9 = vld [vmem:[#allocation2 + $0x2cc] ss:$16 sps:$4 sm:$0xff]  }
  0x28   : > { %v1417_v25 = vld [vmem:[#allocation2 + $0x224] ss:$16 sps:$4 sm:$0xff]   ;;  %v1420_v27 = vld [vmem:[#allocation2 + $0x220] ss:$16 sps:$4 sm:$0xff]   ;;  %v1487_v10 = vld [vmem:[#allocation2 + $0xc8] ss:$16 sps:$4 sm:$0xff]  }
  0x29   : > { %966 = vmatpush1.bf16.msra.mxu0 %v1401_v14  ;;  %v1421_v28 = vld [vmem:[#allocation2 + $0x4] ss:$16 sps:$4 sm:$0xff]   ;;  %v1425_v30 = vld [vmem:[#allocation2] ss:$16 sps:$4 sm:$0xff]   ;;  %v1490_v11 = vld [vmem:[#allocation2 + $0x2c8] ss:$16 sps:$4 sm:$0xff]  }
  0x2a   : > { %1009 = vmatpush1.bf16.msra.mxu1 %v1402_v15  ;;  %967 = vmatprep.subr.bf16.mxu0 %v1403_v16  ;;  %v1423_v29 = vld [vmem:[#allocation2 + $0x204] ss:$16 sps:$4 sm:$0xff]   ;;  %v1426_v31 = vld [vmem:[#allocation2 + $0x200] ss:$16 sps:$4 sm:$0xff]   ;;  %v1495_v12 = vld [vmem:[#allocation2 + $0xac] ss:$16 sps:$4 sm:$0xff]  }
  0x2b   : > { %1010 = vmatprep.subr.bf16.mxu1 %v1405_v17  ;;  %v1427_v32 = vld [vmem:[#allocation2 + $0x1e4] ss:$16 sps:$4 sm:$0xff]   ;;  %v1431_v34 = vld [vmem:[#allocation2 + $0x1e0] ss:$16 sps:$4 sm:$0xff]   ;;  %v1498_v13 = vld [vmem:[#allocation2 + $0x2ac] ss:$16 sps:$4 sm:$0xff]  }
  0x2c   : > { %v1429_v33 = vld [vmem:[#allocation2 + $0x3e4] ss:$16 sps:$4 sm:$0xff]   ;;  %v1432_v35 = vld [vmem:[#allocation2 + $0x3e0] ss:$16 sps:$4 sm:$0xff]   ;;  %v1493_v14 = vld [vmem:[#allocation2 + $0xa8] ss:$16 sps:$4 sm:$0xff]  }
  0x2d   : > { %968 = vmatpush1.bf16.msra.mxu0 %v1407_v18  ;;  %v1433_v36 = vld [vmem:[#allocation2 + $0x1c4] ss:$16 sps:$4 sm:$0xff]   ;;  %v1437_v38 = vld [vmem:[#allocation2 + $0x1c0] ss:$16 sps:$4 sm:$0xff]   ;;  %v1496_v15 = vld [vmem:[#allocation2 + $0x2a8] ss:$16 sps:$4 sm:$0xff]  }
  0x2e   : > { %1011 = vmatpush1.bf16.msra.mxu1 %v1408_v19  ;;  %969 = vmatprep.subr.bf16.mxu0 %v1409_v20  ;;  %v1435_v37 = vld [vmem:[#allocation2 + $0x3c4] ss:$16 sps:$4 sm:$0xff]   ;;  %v1438_v39 = vld [vmem:[#allocation2 + $0x3c0] ss:$16 sps:$4 sm:$0xff]   ;;  %v1501_v16 = vld [vmem:[#allocation2 + $0x8c] ss:$16 sps:$4 sm:$0xff]  }
  0x2f   : > { %1012 = vmatprep.subr.bf16.mxu1 %v1411_v21  ;;  %v1439_v40 = vld [vmem:[#allocation2 + $0x1a4] ss:$16 sps:$4 sm:$0xff]   ;;  %v1443_v42 = vld [vmem:[#allocation2 + $0x1a0] ss:$16 sps:$4 sm:$0xff]   ;;  %v1504_v17 = vld [vmem:[#allocation2 + $0x28c] ss:$16 sps:$4 sm:$0xff]  }
  0x30   : > { %v1441_v41 = vld [vmem:[#allocation2 + $0x3a4] ss:$16 sps:$4 sm:$0xff]   ;;  %v1444_v43 = vld [vmem:[#allocation2 + $0x3a0] ss:$16 sps:$4 sm:$0xff]   ;;  %v1499_v18 = vld [vmem:[#allocation2 + $0x88] ss:$16 sps:$4 sm:$0xff]  }
  0x31   : > { %970 = vmatpush1.bf16.msra.mxu0 %v1413_v22  ;;  %v1445_v44 = vld [vmem:[#allocation2 + $0x184] ss:$16 sps:$4 sm:$0xff]   ;;  %v1449_v46 = vld [vmem:[#allocation2 + $0x180] ss:$16 sps:$4 sm:$0xff]   ;;  %v1502_v19 = vld [vmem:[#allocation2 + $0x288] ss:$16 sps:$4 sm:$0xff]  }
  0x32   : > { %1013 = vmatpush1.bf16.msra.mxu1 %v1414_v23  ;;  %971 = vmatprep.subr.bf16.mxu0 %v1415_v24  ;;  %v1447_v45 = vld [vmem:[#allocation2 + $0x384] ss:$16 sps:$4 sm:$0xff]   ;;  %v1450_v47 = vld [vmem:[#allocation2 + $0x380] ss:$16 sps:$4 sm:$0xff]   ;;  %v1507_v20 = vld [vmem:[#allocation2 + $0x6c] ss:$16 sps:$4 sm:$0xff]  }
  0x33   : > { %1014 = vmatprep.subr.bf16.mxu1 %v1417_v25  ;;  %v1451_v48 = vld [vmem:[#allocation2 + $0x164] ss:$16 sps:$4 sm:$0xff]   ;;  %v1455_v52 = vld [vmem:[#allocation2 + $0x160] ss:$16 sps:$4 sm:$0xff]   ;;  %v1510_v21 = vld [vmem:[#allocation2 + $0x26c] ss:$16 sps:$4 sm:$0xff]  }
  0x34   : > { %v1477_v49 = vld [vmem:[%s1672_s24 + $0x4] ss:$16 sps:$4 sm:$0xff]   ;;  %v1456_v53 = vld [vmem:[#allocation2 + $0x360] ss:$16 sps:$4 sm:$0xff]   ;;  %v1505_v22 = vld [vmem:[#allocation2 + $0x68] ss:$16 sps:$4 sm:$0xff]  }
  0x35   : > { %972 = vmatpush1.bf16.msra.mxu0 %v1419_v26  ;;  %v1453_v50 = vld [vmem:[#allocation2 + $0x364] ss:$16 sps:$4 sm:$0xff]   ;;  %991 = vmatprep.mubr.bf16.mxu0 %v1477_v49  ;;  %v1461_v56 = vld [vmem:[#allocation2 + $0x140] ss:$16 sps:$4 sm:$0xff]   ;;  %v1508_v23 = vld [vmem:[#allocation2 + $0x268] ss:$16 sps:$4 sm:$0xff]  }
  0x36   : > { %1015 = vmatpush1.bf16.msra.mxu1 %v1420_v27  ;;  %973 = vmatprep.subr.bf16.mxu0 %v1421_v28  ;;  %v1457_v54 = vld [vmem:[#allocation2 + $0x144] ss:$16 sps:$4 sm:$0xff]   ;;  %v1462_v57 = vld [vmem:[#allocation2 + $0x340] ss:$16 sps:$4 sm:$0xff]   ;;  %v1513_v24 = vld [vmem:[#allocation2 + $0x4c] ss:$16 sps:$4 sm:$0xff]  }
  0x37   : > { %1016 = vmatprep.subr.bf16.mxu1 %v1423_v29  ;;  %v1459_v55 = vld [vmem:[#allocation2 + $0x344] ss:$16 sps:$4 sm:$0xff]   ;;  %v1467_v60 = vld [vmem:[#allocation2 + $0x120] ss:$16 sps:$4 sm:$0xff]   ;;  %v1516_v25 = vld [vmem:[#allocation2 + $0x24c] ss:$16 sps:$4 sm:$0xff]  }
  0x38   : > { %v1463_v58 = vld [vmem:[#allocation2 + $0x124] ss:$16 sps:$4 sm:$0xff]   ;;  %v1468_v61 = vld [vmem:[#allocation2 + $0x320] ss:$16 sps:$4 sm:$0xff]   ;;  %v1511_v26 = vld [vmem:[#allocation2 + $0x48] ss:$16 sps:$4 sm:$0xff]  }
  0x39   : > { %974 = vmatpush1.bf16.msra.mxu0 %v1425_v30  ;;  %v1465_v59 = vld [vmem:[#allocation2 + $0x324] ss:$16 sps:$4 sm:$0xff]   ;;  %v1473_v0 = vld [vmem:[#allocation2 + $0x100] ss:$16 sps:$4 sm:$0xff]   ;;  %v1514_v27 = vld [vmem:[#allocation2 + $0x248] ss:$16 sps:$4 sm:$0xff]  }
  0x3a   : > { %1017 = vmatpush1.bf16.msra.mxu1 %v1426_v31  ;;  %975 = vmatprep.subr.bf16.mxu0 %v1427_v32  ;;  %v1469_v62 = vld [vmem:[#allocation2 + $0x104] ss:$16 sps:$4 sm:$0xff]   ;;  %v1474_v1 = vld [vmem:[#allocation2 + $0x300] ss:$16 sps:$4 sm:$0xff]   ;;  %v1519_v28 = vld [vmem:[#allocation2 + $0x2c] ss:$16 sps:$4 sm:$0xff]  }
  0x3b   : > { %1018 = vmatprep.subr.bf16.mxu1 %v1429_v33  ;;  %v1471_v63 = vld [vmem:[#allocation2 + $0x304] ss:$16 sps:$4 sm:$0xff]   ;;  %v1677_v4 = vld [vmem:[%s1672_s24] ss:$16 sps:$4 sm:$0xff]   ;;  %v1522_v29 = vld [vmem:[#allocation2 + $0x22c] ss:$16 sps:$4 sm:$0xff]  }
  0x3c   : > { %v1517_v30 = vld [vmem:[#allocation2 + $0x28] ss:$16 sps:$4 sm:$0xff]   ;;  %v1525_v32 = vld [vmem:[#allocation2 + $0xc] ss:$16 sps:$4 sm:$0xff]  }
  0x3d   : > { %976 = vmatpush2.bf16.msra.mxu0 %v1431_v34  ;;  %v1520_v31 = vld [vmem:[#allocation2 + $0x228] ss:$16 sps:$4 sm:$0xff]   ;;  %v1528_v33 = vld [vmem:[#allocation2 + $0x20c] ss:$16 sps:$4 sm:$0xff]  }
  0x3e   : > { %1019 = vmatpush2.bf16.msra.mxu1 %v1432_v35  ;;  %977 = vmatprep.subr.bf16.mxu0 %v1433_v36  ;;  %v1523_v34 = vld [vmem:[#allocation2 + $0x8] ss:$16 sps:$4 sm:$0xff]   ;;  %v1531_v36 = vld [vmem:[#allocation2 + $0x1ec] ss:$16 sps:$4 sm:$0xff]  }
  0x3f   : > { %1020 = vmatprep.subr.bf16.mxu1 %v1435_v37  ;;  %v1526_v35 = vld [vmem:[#allocation2 + $0x208] ss:$16 sps:$4 sm:$0xff]   ;;  %v1534_v37 = vld [vmem:[#allocation2 + $0x3ec] ss:$16 sps:$4 sm:$0xff]  }
  0x41   : > { %978 = vmatpush2.bf16.msra.mxu0 %v1437_v38  ;;  %v1529_v38 = vld [vmem:[#allocation2 + $0x1e8] ss:$16 sps:$4 sm:$0xff]  }
  0x42   : > { %1021 = vmatpush2.bf16.msra.mxu1 %v1438_v39  ;;  %979 = vmatprep.subr.bf16.mxu0 %v1439_v40  ;;  %v1532_v39 = vld [vmem:[#allocation2 + $0x3e8] ss:$16 sps:$4 sm:$0xff]   ;;  %v1537_v40 = vld [vmem:[#allocation2 + $0x1cc] ss:$16 sps:$4 sm:$0xff]  }
  0x43   : > { %1022 = vmatprep.subr.bf16.mxu1 %v1441_v41  ;;  %v1540_v41 = vld [vmem:[#allocation2 + $0x3cc] ss:$16 sps:$4 sm:$0xff]  }
  0x45   : > { %980 = vmatpush2.bf16.msra.mxu0 %v1443_v42  ;;  %v1535_v42 = vld [vmem:[#allocation2 + $0x1c8] ss:$16 sps:$4 sm:$0xff]  }
  0x46   : > { %1023 = vmatpush2.bf16.msra.mxu1 %v1444_v43  ;;  %981 = vmatprep.subr.bf16.mxu0 %v1445_v44  ;;  %v1538_v43 = vld [vmem:[#allocation2 + $0x3c8] ss:$16 sps:$4 sm:$0xff]   ;;  %v1543_v44 = vld [vmem:[#allocation2 + $0x1ac] ss:$16 sps:$4 sm:$0xff]  }
  0x47   : > { %1024 = vmatprep.subr.bf16.mxu1 %v1447_v45  ;;  %v1546_v45 = vld [vmem:[#allocation2 + $0x3ac] ss:$16 sps:$4 sm:$0xff]  }
  0x49   : > { %982 = vmatpush2.bf16.msra.mxu0 %v1449_v46  ;;  %v1541_v46 = vld [vmem:[#allocation2 + $0x1a8] ss:$16 sps:$4 sm:$0xff]  }
  0x4a   : > { %1025 = vmatpush2.bf16.msra.mxu1 %v1450_v47  ;;  %983 = vmatprep.subr.bf16.mxu0 %v1451_v48  ;;  %v1544_v47 = vld [vmem:[#allocation2 + $0x3a8] ss:$16 sps:$4 sm:$0xff]   ;;  %v1549_v48 = vld [vmem:[#allocation2 + $0x18c] ss:$16 sps:$4 sm:$0xff]  }
  0x4b   : > { %1026 = vmatprep.subr.bf16.mxu1 %v1453_v50  ;;  %v1547_v50 = vld [vmem:[#allocation2 + $0x188] ss:$16 sps:$4 sm:$0xff]  }
  0x4d   : > { %984 = vmatpush2.bf16.msra.mxu0 %v1455_v52  ;;  %v1555_v52 = vld [vmem:[#allocation2 + $0x16c] ss:$16 sps:$4 sm:$0xff]  }
  0x4e   : > { %1027 = vmatpush2.bf16.msra.mxu1 %v1456_v53  ;;  %985 = vmatprep.subr.bf16.mxu0 %v1457_v54  ;;  %v1558_v53 = vld [vmem:[#allocation2 + $0x36c] ss:$16 sps:$4 sm:$0xff]   ;;  %v1553_v54 = vld [vmem:[#allocation2 + $0x168] ss:$16 sps:$4 sm:$0xff]  }
  0x4f   : > { %1028 = vmatprep.subr.bf16.mxu1 %v1459_v55  ;;  %v1556_v55 = vld [vmem:[#allocation2 + $0x368] ss:$16 sps:$4 sm:$0xff]  }
  0x51   : > { %986 = vmatpush2.bf16.msra.mxu0 %v1461_v56  ;;  %v1561_v56 = vld [vmem:[#allocation2 + $0x14c] ss:$16 sps:$4 sm:$0xff]  }
  0x52   : > { %1029 = vmatpush2.bf16.msra.mxu1 %v1462_v57  ;;  %987 = vmatprep.subr.bf16.mxu0 %v1463_v58  ;;  %v1564_v57 = vld [vmem:[#allocation2 + $0x34c] ss:$16 sps:$4 sm:$0xff]   ;;  %v1559_v58 = vld [vmem:[#allocation2 + $0x148] ss:$16 sps:$4 sm:$0xff]  }
  0x53   : > { %1030 = vmatprep.subr.bf16.mxu1 %v1465_v59  ;;  %v1562_v59 = vld [vmem:[#allocation2 + $0x348] ss:$16 sps:$4 sm:$0xff]  }
  0x55   : > { %988 = vmatpush2.bf16.msra.mxu0 %v1467_v60  ;;  %v1567_v60 = vld [vmem:[#allocation2 + $0x12c] ss:$16 sps:$4 sm:$0xff]  }
  0x56   : > { %1031 = vmatpush2.bf16.msra.mxu1 %v1468_v61  ;;  %989 = vmatprep.subr.bf16.mxu0 %v1469_v62  ;;  %v1570_v61 = vld [vmem:[#allocation2 + $0x32c] ss:$16 sps:$4 sm:$0xff]   ;;  %v1565_v62 = vld [vmem:[#allocation2 + $0x128] ss:$16 sps:$4 sm:$0xff]  }
  0x57   : > { %1032 = vmatprep.subr.bf16.mxu1 %v1471_v63  ;;  %v1568_v63 = vld [vmem:[#allocation2 + $0x328] ss:$16 sps:$4 sm:$0xff]  }
  0x59   : > { %990 = vmatpush2.bf16.msra.mxu0 %v1473_v0  ;;  %v1573_v0 = vld [vmem:[#allocation2 + $0x10c] ss:$16 sps:$4 sm:$0xff]  }
  0x5a   : > { %1033 = vmatpush2.bf16.msra.mxu1 %v1474_v1  ;;  %1045 = vmatprep.subr.bf16.mxu0 %v1483_v2  ;;  %v1576_v1 = vld [vmem:[#allocation2 + $0x30c] ss:$16 sps:$4 sm:$0xff]   ;;  %v1571_v2 = vld [vmem:[#allocation2 + $0x108] ss:$16 sps:$4 sm:$0xff]  }
  0x5b   : > { %1088 = vmatprep.subr.bf16.mxu1 %v1486_v3  ;;  %v1574_v3 = vld [vmem:[#allocation2 + $0x308] ss:$16 sps:$4 sm:$0xff]  }
  0x5c   : > { %992 = vmatmul.mubr.bf16.vlgmr.msra.gmra.mxu0 %v1677_v4 }
  0x5d   : > { %1035 = vmatmul.mubr.bf16.vlgmr.msra.gmra.mxu1 %v1680_v5  ;;  %1046 = vmatpush1.bf16.msra.mxu0 %v1481_v6 }
  0x5e   : > { %1089 = vmatpush1.bf16.msra.mxu1 %v1484_v7  ;;  %1047 = vmatprep.subr.bf16.mxu0 %v1489_v8 }
  0x5f   : > { %1090 = vmatprep.subr.bf16.mxu1 %v1492_v9  ;;  %1077 = vmatprep.mubr.bf16.mxu0 %v1477_v49  ;;  %v1552_v49 = vld [vmem:[#allocation2 + $0x38c] ss:$16 sps:$4 sm:$0xff]  }
  0x60   : > { %1120 = vmatprep.mubr.bf16.mxu1 %v1480_v51  ;;  %v1550_v51 = vld [vmem:[#allocation2 + $0x388] ss:$16 sps:$4 sm:$0xff]  }
  0x61   : > { %1048 = vmatpush1.bf16.msra.mxu0 %v1487_v10 }
  0x62   : > { %1091 = vmatpush1.bf16.msra.mxu1 %v1490_v11  ;;  %1049 = vmatprep.subr.bf16.mxu0 %v1495_v12 }
  0x63   : > { %1092 = vmatprep.subr.bf16.mxu1 %v1498_v13 }
  0x65   : > { %1050 = vmatpush1.bf16.msra.mxu0 %v1493_v14 }
  0x66   : > { %1093 = vmatpush1.bf16.msra.mxu1 %v1496_v15  ;;  %1051 = vmatprep.subr.bf16.mxu0 %v1501_v16 }
  0x67   : > { %1094 = vmatprep.subr.bf16.mxu1 %v1504_v17 }
  0x69   : > { %1052 = vmatpush1.bf16.msra.mxu0 %v1499_v18 }
  0x6a   : > { %1095 = vmatpush1.bf16.msra.mxu1 %v1502_v19  ;;  %1053 = vmatprep.subr.bf16.mxu0 %v1507_v20 }
  0x6b   : > { %1096 = vmatprep.subr.bf16.mxu1 %v1510_v21 }
  0x6d   : > { %1054 = vmatpush1.bf16.msra.mxu0 %v1505_v22 }
  0x6e   : > { %1097 = vmatpush1.bf16.msra.mxu1 %v1508_v23  ;;  %1055 = vmatprep.subr.bf16.mxu0 %v1513_v24 }
  0x6f   : > { %1098 = vmatprep.subr.bf16.mxu1 %v1516_v25 }
  0x71   : > { %1056 = vmatpush1.bf16.msra.mxu0 %v1511_v26 }
  0x72   : > { %1099 = vmatpush1.bf16.msra.mxu1 %v1514_v27  ;;  %1057 = vmatprep.subr.bf16.mxu0 %v1519_v28 }
  0x73   : > { %1100 = vmatprep.subr.bf16.mxu1 %v1522_v29 }
  0x75   : > { %1058 = vmatpush1.bf16.msra.mxu0 %v1517_v30 }
  0x76   : > { %1101 = vmatpush1.bf16.msra.mxu1 %v1520_v31  ;;  %1059 = vmatprep.subr.bf16.mxu0 %v1525_v32 }
  0x77   : > { %1102 = vmatprep.subr.bf16.mxu1 %v1528_v33 }
  0x79   : > { %1060 = vmatpush1.bf16.msra.mxu0 %v1523_v34 }
  0x7a   : > { %1103 = vmatpush1.bf16.msra.mxu1 %v1526_v35  ;;  %1061 = vmatprep.subr.bf16.mxu0 %v1531_v36 }
  0x7b   : > { %1104 = vmatprep.subr.bf16.mxu1 %v1534_v37 }
  0x7d   : > { %1062 = vmatpush2.bf16.msra.mxu0 %v1529_v38 }
  0x7e   : > { %1105 = vmatpush2.bf16.msra.mxu1 %v1532_v39  ;;  %1063 = vmatprep.subr.bf16.mxu0 %v1537_v40 }
  0x7f   : > { %1106 = vmatprep.subr.bf16.mxu1 %v1540_v41 }
  0x81   : > { %1064 = vmatpush2.bf16.msra.mxu0 %v1535_v42 }
  0x82   : > { %1107 = vmatpush2.bf16.msra.mxu1 %v1538_v43  ;;  %1065 = vmatprep.subr.bf16.mxu0 %v1543_v44 }
  0x83   : > { %1108 = vmatprep.subr.bf16.mxu1 %v1546_v45 }
  0x85   : > { %1066 = vmatpush2.bf16.msra.mxu0 %v1541_v46 }
  0x86   : > { %1109 = vmatpush2.bf16.msra.mxu1 %v1544_v47  ;;  %1067 = vmatprep.subr.bf16.mxu0 %v1549_v48 }
  0x87   : > { %1110 = vmatprep.subr.bf16.mxu1 %v1552_v49 }
  0x89   : > { %1068 = vmatpush2.bf16.msra.mxu0 %v1547_v50 }
  0x8a   : > { %1111 = vmatpush2.bf16.msra.mxu1 %v1550_v51  ;;  %1069 = vmatprep.subr.bf16.mxu0 %v1555_v52 }
  0x8b   : > { %1112 = vmatprep.subr.bf16.mxu1 %v1558_v53 }
  0x8d   : > { %1070 = vmatpush2.bf16.msra.mxu0 %v1553_v54 }
  0x8e   : > { %1113 = vmatpush2.bf16.msra.mxu1 %v1556_v55  ;;  %1071 = vmatprep.subr.bf16.mxu0 %v1561_v56 }
  0x8f   : > { %1114 = vmatprep.subr.bf16.mxu1 %v1564_v57 }
  0x91   : > { %1072 = vmatpush2.bf16.msra.mxu0 %v1559_v58 }
  0x92   : > { %1115 = vmatpush2.bf16.msra.mxu1 %v1562_v59  ;;  %1073 = vmatprep.subr.bf16.mxu0 %v1567_v60 }
  0x93   : > { %1116 = vmatprep.subr.bf16.mxu1 %v1570_v61 }
  0x95   : > { %1074 = vmatpush2.bf16.msra.mxu0 %v1565_v62 }
  0x96   : > { %1117 = vmatpush2.bf16.msra.mxu1 %v1568_v63  ;;  %1075 = vmatprep.subr.bf16.mxu0 %v1573_v0 }
  0x97   : > { %1118 = vmatprep.subr.bf16.mxu1 %v1576_v1 }
  0x99   : > { %1076 = vmatpush2.bf16.msra.mxu0 %v1571_v2 }
  0x9a   : > { %1119 = vmatpush2.bf16.msra.mxu1 %v1574_v3 }
  0x9c   : > { %1078 = vmatmul.mubr.bf16.vlgmr.msra.gmra.mxu0 %v1677_v4 }
  0x9d   : > { %1121 = vmatmul.mubr.bf16.vlgmr.msra.gmra.mxu1 %v1680_v5 }
 0x11c   : > { %v993_v6 = vpop.f32.mrf.mxu0 }
 0x11d   : > { %v1036_v7 = vpop.f32.mrf.mxu1 }
 0x11e   : > { %v1037_v8 = vadd.f32 %v1036_v7, %v993_v6  ;;  %v995_v9 = vpop.f32.mrf.mxu0 }
 0x11f   : > { %v1038_v10 = vpop.f32.mrf.mxu1 }
 0x120   : > { %1131 = vst [vmem:[%s1690_s28] sm:$0xff] %v1037_v8  ;;  %v1039_v4 = vadd.f32 %v1038_v10, %v995_v9  ;;  %v997_v11 = vpop.f32.mrf.mxu0 }
 0x121   : > { %v1040_v5 = vpop.f32.mrf.mxu1 }
 0x122   : > { %1132 = vst [vmem:[%s1690_s28 + $0x8] sm:$0xff] %v1039_v4  ;;  %v1041_v12 = vadd.f32 %v1040_v5, %v997_v11  ;;  %v999_v13 = vpop.f32.mrf.mxu0 }
 0x123   : > { %v1042_v14 = vpop.f32.mrf.mxu1 }
 0x124   : > { %1135 = vst [vmem:[%s1690_s28 + $0x20] sm:$0xff] %v1041_v12  ;;  %v1043_v15 = vadd.f32 %v1042_v14, %v999_v13 }
 0x126   : > { %1136 = vst [vmem:[%s1690_s28 + $0x28] sm:$0xff] %v1043_v15 }
 0x15c   : > { %v1079_v16 = vpop.f32.mrf.mxu0 }
 0x15d   : > { %v1122_v17 = vpop.f32.mrf.mxu1 }
 0x15e   : > { %v1123_v18 = vadd.f32 %v1122_v17, %v1079_v16  ;;  %v1081_v19 = vpop.f32.mrf.mxu0 }
 0x15f   : > { %v1124_v20 = vpop.f32.mrf.mxu1 }
 0x160   : > { %1133 = vst [vmem:[%s1690_s28 + $0x10] sm:$0xff] %v1123_v18  ;;  %v1125_v21 = vadd.f32 %v1124_v20, %v1081_v19  ;;  %v1083_v22 = vpop.f32.mrf.mxu0 }
 0x161   : > { %v1126_v23 = vpop.f32.mrf.mxu1 }
 0x162   : > { %1134 = vst [vmem:[%s1690_s28 + $0x18] sm:$0xff] %v1125_v21  ;;  %v1127_v24 = vadd.f32 %v1126_v23, %v1083_v22  ;;  %v1085_v25 = vpop.f32.mrf.mxu0 }
 0x163   : > { %v1128_v26 = vpop.f32.mrf.mxu1 }
 0x164   : > { %1137 = vst [vmem:[%s1690_s28 + $0x30] sm:$0xff] %v1127_v24  ;;  %v1129_v27 = vadd.f32 %v1128_v26, %v1085_v25 }
 0x166   : > { %1138 = vst [vmem:[%s1690_s28 + $0x38] sm:$0xff] %v1129_v27 }
 0x167 PF: > { %s13_s9 = sadd.s32 1, %s1613_s9  }
 0x168   : > { %p10_p1 = scmp.ge.s32.totalorder %s13_s9, 4  }
 0x16a   :  { %12 = sbr.rel (!%p10_p1) target bundleno = 1 (0x1), region = 63 }
 0x16f   :  { %1163 = vsyncpa [#allocation3], 1 }
 0x170   :  { %1165 = vsyncpa [#allocation3 + $0x1], 1 }

</bundles_post_ra>
